<compile_context>
chip_gen: v7x
topology: tpu7x:2x2x1
jax: 0.10.0
libtpu: 0.0.40
codegen_flags: <defaults>
</compile_context>

<pallas_src>
import functools

import jax
import jax.numpy as jnp
import numpy as np
from jax.experimental import pallas as pl
from jax.experimental.pallas import tpu as pltpu

EPSILON = float(np.finfo(np.float32).eps)


def _round_up(n, m):
    return ((n + m - 1) // m) * m


def _pick_tile(dim, cap, align):
    """Largest tile <= cap that is a multiple of `align` and divides `dim`;
    falls back to the full dim (always a legal block shape)."""
    if dim <= cap:
        return dim
    t = (cap // align) * align
    while t >= align:
        if dim % t == 0:
            return t
        t -= align
    return dim


def _frnmf_kernel(y_ref, x_ref, w1t_ref, w2tp_ref, o_ref, acc_ref, *, comp):
    k = pl.program_id(1)

    # Init the numerator accumulator at the start of the feature reduction.
    @pl.when(k == 0)
    def _():
        acc_ref[...] = jnp.zeros_like(acc_ref)

    # numerator += x_tile @ W2^T_tile  (N padded to a multiple of 128 for MXU)
    acc_ref[...] += jnp.dot(x_ref[...], w2tp_ref[...],
                            preferred_element_type=jnp.float32)

    # Finalize: small denominator matmul + elementwise epilogue + store.
    @pl.when(k == pl.num_programs(1) - 1)
    def _():
        y = y_ref[...]                                      # [TM, comp]
        den = jnp.dot(y, w1t_ref[...],                      # [TM, comp]
                      preferred_element_type=jnp.float32)
        den = jnp.where(den == 0.0, EPSILON, den)           # torch: den[den==0]=EPS
        num = acc_ref[:, :comp]                             # drop MXU padding cols
        delta = num * pl.reciprocal(den, approx=False)      # EUP, not VPU divide
        o_ref[...] = (delta * y).astype(o_ref.dtype)


def frnmf_layer(y, x, w1, w2, *, tm_cap=512, tk_cap=2048):
    """
    y : [B, comp]       float32
    x : [B, features]   float32
    w1: [comp, comp]      (nn.Linear(comp, comp, bias=False).weight)
    w2: [comp, features]  (nn.Linear(features, comp, bias=False).weight)
    """
    B, comp = y.shape
    Bx, features = x.shape
    assert Bx == B, "y and x must share the batch dimension"

    # ---- one-time layout prep (in production: keep these in model state) ----
    comp_pad = _round_up(comp, 128)
    w1t = jnp.asarray(w1).T                                  # [comp, comp]
    w2t_pad = jnp.pad(jnp.asarray(w2).T,                     # [features, comp_pad]
                      ((0, 0), (0, comp_pad - comp)))

    # ---- tiling --------------------------------------------------------------
    TM = _pick_tile(B, tm_cap, 8)            # batch tile (sublane-aligned)
    TK = _pick_tile(features, tk_cap, 128)   # feature reduction tile (lane-aligned)
    grid = (B // TM, features // TK)

    kernel = functools.partial(_frnmf_kernel, comp=comp)

    return pl.pallas_call(
        kernel,
        out_shape=jax.ShapeDtypeStruct((B, comp), jnp.float32),
        grid_spec=pltpu.PrefetchScalarGridSpec(
            num_scalar_prefetch=0,
            grid=grid,
            in_specs=[
                pl.BlockSpec((TM, comp), lambda i, k: (i, 0)),      # y (resident over k)
                pl.BlockSpec((TM, TK), lambda i, k: (i, k)),        # x (streamed)
                pl.BlockSpec((comp, comp), lambda i, k: (0, 0)),    # W1^T (resident)
                pl.BlockSpec((TK, comp_pad), lambda i, k: (k, 0)),  # W2^T padded (streamed)
            ],
            out_specs=pl.BlockSpec((TM, comp), lambda i, k: (i, 0)),
            scratch_shapes=[pltpu.VMEM((TM, comp_pad), jnp.float32)],
        ),
        compiler_params=pltpu.CompilerParams(
            dimension_semantics=("parallel", "arbitrary"),
            vmem_limit_bytes=48 * 1024 * 1024,
        ),
    )(y, x, w1t, w2t_pad)


def frnmf_reference(y, x, w1, w2):
    den = y @ w1.T
    num = x @ w2.T
    den = jnp.where(den == 0.0, EPSILON, den)
    return (num / den) * y


if __name__ == "__main__":
    # Small shapes consistent with the module; tile caps chosen so the grid
    # actually exercises both the batch axis and the feature reduction (2x2).
    B, comp, features = 16, 32, 256

    key = jax.random.PRNGKey(0)
    k_y, k_x, k_w1, k_w2 = jax.random.split(key, 4)

    # NMF-style inputs / factors are non-negative.
    y = jax.random.uniform(k_y, (B, comp), dtype=jnp.float32) + 0.1
    x = jax.random.uniform(k_x, (B, features), dtype=jnp.float32)

    bound1 = 1.0 / np.sqrt(comp)
    bound2 = 1.0 / np.sqrt(features)
    w1 = jax.random.uniform(k_w1, (comp, comp), minval=0.0, maxval=bound1,
                            dtype=jnp.float32)
    w2 = jax.random.uniform(k_w2, (comp, features), minval=0.0, maxval=bound2,
                            dtype=jnp.float32)

    out = frnmf_layer(y, x, w1, w2, tm_cap=8, tk_cap=128)   # force a 2x2 grid
    out = jax.block_until_ready(out)

    ref = frnmf_reference(y, x, w1, w2)
    np.testing.assert_allclose(np.asarray(out), np.asarray(ref),
                               rtol=1e-5, atol=1e-5)

    print("KERNEL_OK")
</pallas_src>

<mosaic_0001>
module attributes {stable_mosaic.version = 11 : i64} {
  func.func @_frnmf_kernel(%arg0: i32, %arg1: i32, %arg2: memref<8x32xf32, #tpu.memory_space<vmem>>, %arg3: memref<8x128xf32, #tpu.memory_space<vmem>>, %arg4: memref<32x32xf32, #tpu.memory_space<vmem>>, %arg5: memref<128x128xf32, #tpu.memory_space<vmem>>, %arg6: memref<8x32xf32, #tpu.memory_space<vmem>>, %arg7: memref<8x128xf32, #tpu.memory_space<vmem>>) attributes {dimension_semantics = [#tpu.dimension_semantics<parallel>, #tpu.dimension_semantics<arbitrary>], iteration_bounds = array<i64: 2, 2>, scalar_prefetch = 0 : i64, scratch_operands = 1 : i64, tpu.core_type = #tpu.core_type<tc>, window_params = [{transform_indices = @transform_0, window_bounds = array<i64: 8, 32>}, {transform_indices = @transform_1, window_bounds = array<i64: 8, 128>}, {pipeline_mode = #tpu.pipeline_mode<synchronous>, transform_indices = @transform_2, window_bounds = array<i64: 32, 32>}, {transform_indices = @transform_3, window_bounds = array<i64: 128, 128>}, {transform_indices = @transform_4, window_bounds = array<i64: 8, 32>}]} {
    %c0_i32 = arith.constant 0 : i32
    %0 = arith.cmpi eq, %arg1, %c0_i32 : i32
    %1 = arith.extui %0 : i1 to i32
    %c0_i32_0 = arith.constant 0 : i32
    %2 = arith.cmpi ne, %1, %c0_i32_0 : i32
    scf.if %2 {
      %cst_9 = arith.constant 0.000000e+00 : f32
      %12 = vector.broadcast %cst_9 : f32 to vector<8x128xf32>
      %c0_10 = arith.constant 0 : index
      %c0_11 = arith.constant 0 : index
      %13 = vector.load %arg7[%c0_10, %c0_11] : memref<8x128xf32, #tpu.memory_space<vmem>>, vector<8x128xf32>
      tpu.vector_store %arg7[%c0_10, %c0_11], %12 {strides = array<i32>} : memref<8x128xf32, #tpu.memory_space<vmem>>, vector<8x128xf32>,
    } else {
    }
    %c0 = arith.constant 0 : index
    %c0_1 = arith.constant 0 : index
    %3 = vector.load %arg7[%c0, %c0_1] : memref<8x128xf32, #tpu.memory_space<vmem>>, vector<8x128xf32>
    %c0_2 = arith.constant 0 : index
    %c0_3 = arith.constant 0 : index
    %4 = vector.load %arg3[%c0_2, %c0_3] : memref<8x128xf32, #tpu.memory_space<vmem>>, vector<8x128xf32>
    %c0_4 = arith.constant 0 : index
    %c0_5 = arith.constant 0 : index
    %5 = vector.load %arg5[%c0_4, %c0_5] : memref<128x128xf32, #tpu.memory_space<vmem>>, vector<128x128xf32>
    %cst = arith.constant dense<0.000000e+00> : vector<8x128xf32>
    %6 = tpu.matmul %4, %5, %cst {dimension_numbers = #tpu.dot_dimension_numbers<[1], [0], [0], [1], [0, 0, 1, 1], [], []>} : vector<8x128xf32>, vector<128x128xf32>, vector<8x128xf32> -> vector<8x128xf32>
    %7 = arith.addf %3, %6 : vector<8x128xf32>
    %c0_6 = arith.constant 0 : index
    %c0_7 = arith.constant 0 : index
    %8 = vector.load %arg7[%c0_6, %c0_7] : memref<8x128xf32, #tpu.memory_space<vmem>>, vector<8x128xf32>
    tpu.vector_store %arg7[%c0_6, %c0_7], %7 {strides = array<i32>} : memref<8x128xf32, #tpu.memory_space<vmem>>, vector<8x128xf32>,
    %c1_i32 = arith.constant 1 : i32
    %9 = arith.cmpi eq, %arg1, %c1_i32 : i32
    %10 = arith.extui %9 : i1 to i32
    %c0_i32_8 = arith.constant 0 : i32
    %11 = arith.cmpi ne, %10, %c0_i32_8 : i32
    scf.if %11 {
      %c0_9 = arith.constant 0 : index
      %c0_10 = arith.constant 0 : index
      %12 = vector.load %arg2[%c0_9, %c0_10] : memref<8x32xf32, #tpu.memory_space<vmem>>, vector<8x32xf32>
      %c0_11 = arith.constant 0 : index
      %c0_12 = arith.constant 0 : index
      %13 = vector.load %arg4[%c0_11, %c0_12] : memref<32x32xf32, #tpu.memory_space<vmem>>, vector<32x32xf32>
      %cst_13 = arith.constant dense<0.000000e+00> : vector<8x32xf32>
      %14 = tpu.matmul %12, %13, %cst_13 {dimension_numbers = #tpu.dot_dimension_numbers<[1], [0], [0], [1], [0, 0, 1, 1], [], []>} : vector<8x32xf32>, vector<32x32xf32>, vector<8x32xf32> -> vector<8x32xf32>
      %cst_14 = arith.constant 0.000000e+00 : f32
      %15 = vector.broadcast %cst_14 : f32 to vector<8x32xf32>
      %16 = arith.cmpf oeq, %14, %15 : vector<8x32xf32>
      %cst_15 = arith.constant 1.1920929E-7 : f32
      %17 = vector.broadcast %cst_15 : f32 to vector<8x32xf32>
      %18 = arith.select %16, %17, %14 : vector<8x32xi1>, vector<8x32xf32>
      %c0_16 = arith.constant 0 : index
      %c0_17 = arith.constant 0 : index
      %19 = vector.load %arg7[%c0_16, %c0_17] : memref<8x128xf32, #tpu.memory_space<vmem>>, vector<8x32xf32>
      %20 = tpu.reciprocal %18 : vector<8x32xf32> -> vector<8x32xf32>
      %21 = arith.mulf %19, %20 : vector<8x32xf32>
      %22 = arith.mulf %21, %12 : vector<8x32xf32>
      %c0_18 = arith.constant 0 : index
      %c0_19 = arith.constant 0 : index
      %23 = vector.load %arg6[%c0_18, %c0_19] : memref<8x32xf32, #tpu.memory_space<vmem>>, vector<8x32xf32>
      tpu.vector_store %arg6[%c0_18, %c0_19], %22 {strides = array<i32>} : memref<8x32xf32, #tpu.memory_space<vmem>>, vector<8x32xf32>,
    } else {
    }
    return
  }
  func.func @transform_0(%arg0: i32, %arg1: i32) -> (i32, i32) {
    %c0_i32 = arith.constant 0 : i32
    %c0_i32_0 = arith.constant 0 : i32
    return %arg0, %c0_i32 : i32, i32
  }
  func.func @transform_1(%arg0: i32, %arg1: i32) -> (i32, i32) {
    %c0_i32 = arith.constant 0 : i32
    return %arg0, %arg1 : i32, i32
  }
  func.func @transform_2(%arg0: i32, %arg1: i32) -> (i32, i32) {
    %c0_i32 = arith.constant 0 : i32
    %c0_i32_0 = arith.constant 0 : i32
    %c0_i32_1 = arith.constant 0 : i32
    return %c0_i32, %c0_i32_0 : i32, i32
  }
  func.func @transform_3(%arg0: i32, %arg1: i32) -> (i32, i32) {
    %c0_i32 = arith.constant 0 : i32
    %c0_i32_0 = arith.constant 0 : i32
    return %arg1, %c0_i32 : i32, i32
  }
  func.func @transform_4(%arg0: i32, %arg1: i32) -> (i32, i32) {
    %c0_i32 = arith.constant 0 : i32
    %c0_i32_0 = arith.constant 0 : i32
    return %arg0, %c0_i32 : i32, i32
  }
}

</mosaic_0001>

<bundles_post_ra>
// kernel: tpu_custom_call.1
= control target key start
LH: loop header
LB: loop body
LE: loop exit
PB: predicated region body
PF: predicated region fallthrough
CT: control target
= control target key end

     0   :  { %s1714_s0 = inlined_call_operand.hbm [shape: f32[16,32], index: 0, kind: input, shape index: {}]   ;;  %s1715_s1 = inlined_call_operand.hbm [shape: f32[16,256], index: 1, kind: input, shape index: {}]   ;;  %s1716_s2 = inlined_call_operand.hbm [shape: f32[32,32], index: 2, kind: input, shape index: {}]   ;;  %s1717_s3 = inlined_call_operand.hbm [shape: f32[256,128], index: 3, kind: input, shape index: {}]   ;;  %s1718_s4 = inlined_call_operand.hbm [shape: f32[16,32], index: 4, kind: output, shape index: {}]  }
   0x1   :  { %1741 = sst [smem:[#allocation28_spill]] %s1714_s0 }
   0x2   :  { %1742 = sst [smem:[#allocation29_spill]] %s1716_s2 }
   0x3   :  { %1743 = sst [smem:[#allocation30_spill]] %s1718_s4 }
   0x4   :  { %9 = vsyncpa [#allocation4], 0 }
   0x5   :  { %11 = vsyncpa [#allocation4 + $0x1], 0 }
   0x6   :  { %12 = vsyncpa [#allocation7], 0 }
   0x7   :  { %14 = vsyncpa [#allocation7 + $0x1], 0 }
   0x8   :  { %15 = vsyncpa [#allocation10], 0 }
   0x9   :  { %17 = vsyncpa [#allocation10 + $0x1], 0 }
   0xa   :  { %18 = vsyncpa [#allocation5], 0 }
   0xb   :  { %20 = vsyncpa [#allocation5 + $0x1], 0  ;;  %s1258_s15 = smov 0   ;;  %s1260_s16 = smov 0  }
   0xc   :  { %s1262_s17 = smov 0   ;;  %s1264_s18 = smov 0  }
   0xd   :  { %s1266_s19 = smov 0   ;;  %s1268_s20 = smov 0  }
   0xe   :  { %s1270_s21 = smov 0   ;;  %s1272_s22 = smov 0  }
   0xf   :  { %s1274_s23 = smov 0   ;;  %s1276_s24 = smov 0  }
  0x10   :  { %s1278_s25 = smov 0   ;;  %s1280_s26 = smov 0  }
  0x11   :  { %s1282_s27 = smov 0   ;;  %s1284_s28 = smov 0  }
  0x12 LB: > { %1744 = sst [smem:[#allocation17_spill]] %s1181_s19  ;;  %s1329_s29 = sadd.s32 4294967295, %s1217_s28   ;;  %s1217_s28 = sphi %s1284_s28, %s26_s28   ;;  %s1213_s27 = sphi %s1282_s27, %s1815_s27   ;;  %s1209_s26 = sphi %s1280_s26, %s1814_s26   ;;  %s1205_s25 = sphi %s1278_s25, %s1813_s25   ;;  %s1201_s24 = sphi %s1276_s24, %s1812_s24   ;;  %s1197_s23 = sphi %s1274_s23, %s1811_s23   ;;  %s1193_s22 = sphi %s1272_s22, %s1810_s22   ;;  %s1189_s21 = sphi %s1270_s21, %s1802_s21   ;;  %s1185_s20 = sphi %s1268_s20, %s1809_s20   ;;  %s1181_s19 = sphi %s1266_s19, %s1808_s19   ;;  %s1177_s18 = sphi %s1264_s18, %s1801_s18   ;;  %s1173_s17 = sphi %s1262_s17, %s1807_s17   ;;  %s1169_s16 = sphi %s1260_s16, %s1806_s16   ;;  %s1165_s15 = sphi %s1258_s15, %s1805_s15  }
  0x13   : > { %1745 = sst [smem:[#allocation18_spill]] %s1189_s21  ;;  %p660_p0 = scmp.ge.s32.totalorder %s1217_s28, 1 }
  0x14   : > { %1746 = sst [smem:[#allocation19_spill]] %s1193_s22  ;;  %p1719_p1 = scmp.eq.s32.totalorder %s1329_s29, 0 }
  0x15   : > { %1747 = sst [smem:[#allocation20_spill]] %s1201_s24  ;;  %p170_p2 = scmp.lt.s32.totalorder %s1217_s28, 5 }
  0x16   : > { %1748 = sst [smem:[#allocation21_spill]] %s1205_s25  ;;  %s1219_s5 = smov [#allocation8]  }
  0x17   : > { %p1334_p3 = pnand %p660_p0, %p170_p2  ;;  %s182_s6 = sshll.u32 %s1219_s5, 4  ;;  %s183_s6 = int_to_ptr.vmem [resolvable:$true] %s182_s6 }
  0x18   : > { %s1752_s2 = sld [smem:[#allocation29_spill]] }
  0x19   : > { %s1749_s30 = scalar_select %p1334_p3, 1, 0 }
  0x1a   : > { %p795_p4 = pneg %p1334_p3 }
  0x1b   : > { %1750 = sst [smem:[#allocation22_spill]] %s1749_s30 }
  0x1c   : > { %p1342_p5 = pnand %p795_p4, %p1719_p1 }
  0x1e   : > { %s941_s10 = scalar_lea.hbm %s1752_s2, 512  ;;  %p943_p7 = pneg %p1342_p5 }
  0x1f   : > { %p942_p6 = scmp.ne.s32.totalorder %s1752_s2, %s941_s10  ;;  %p948_p10 = scmp.lt.u32.totalorder %s941_s10, %s1752_s2 }
  0x21   : > { %p944_p8 = pnand %p943_p7, %p942_p6 }
  0x23   : > { %p945_p9 = pneg %p944_p8 }
  0x25   : > { %p950_p11 = pnand %p948_p10, %p945_p9 }
  0x27   : > { %953 = shalt.err (!%p950_p11)
}
  0x28   : > { %s954_s5 = scalar_lea.vmem %s183_s6, 512  ;;  %p962_p2 = scmp.lt.s32.totalorder %s183_s6, %s183_s6 }
  0x29   : > { %p955_p12 = scmp.ne.s32.totalorder %s183_s6, %s954_s5  ;;  %p963_p4 = scmp.lt.s32.totalorder %s954_s5, %s954_s5 }
  0x2b   : > { %p957_p13 = pnand %p955_p12, %p943_p7  ;;  %p964_p1 = por %p963_p4, %p962_p2 }
  0x2d   : > { %p958_p0 = pneg %p957_p13 }
  0x2f   : > { %p965_p3 = pnand %p964_p1, %p958_p0 }
  0x31   : > { %968 = shalt.err (!%p965_p3)
}
  0x32   : > { %s1721_s8 = smov 128   ;;  %s1722_s9 = smov 8  }
  0x33   : > { %798 = dma.hbm_to_vmem [thread:$0]  (!%p1342_p5), %s1752_s2, 512, %s183_s6, [#allocation7], %s1721_s8, %s1721_s8, %s1722_s9  }
  0x34   : > { %s659_s12 = sadd.s32 4294967294, %s1217_s28   ;;  %p52_p1 = scmp.ne.s32.totalorder %s1197_s23, %s1193_s22 }
  0x35   : > { %p1727_p3 = scmp.eq.s32.totalorder %s1217_s28, 0  ;;  %p58_p6 = scmp.ne.s32.totalorder %s1193_s22, %s1189_s21 }
  0x36   : > { %p157_p7 = scmp.eq.s32.totalorder %s1329_s29, 3  ;;  %p163_p9 = scmp.eq.s32.totalorder %s659_s12, 3 }
  0x37   : > { %p54_p8 = por %p1727_p3, %p52_p1  ;;  %p1753_p10 = scmp.eq.s32.totalorder %s1329_s29, 0 }
  0x38   : > { %p1382_p12 = por %p157_p7, %p52_p1  ;;  %p1386_p5 = por %p163_p9, %p58_p6 }
  0x39   : > { %p1378_p11 = por %p1753_p10, %p58_p6  ;;  %p1726_p13 = scmp.lt.s32.totalorder %s1217_s28, 4 }
  0x3a   : > { %s1756_s5 = scalar_select %p1382_p12, 1, 0 }
  0x3b   : > { %s1754_s7 = scalar_select %p1378_p11, 1, 0 }
  0x3c   : > { %1757 = sst [smem:[#allocation24_spill]] %s1756_s5  ;;  %s196_s10 = sand.u32 1, %s1197_s23  }
  0x3d   : > { %1755 = sst [smem:[#allocation23_spill]] %s1754_s7  ;;  %s664_s11 = sshll.u32 %s1213_s27, 7 }
  0x3e   : > { %s1758_s6 = scalar_select %p1386_p5, 1, 0 }
  0x3f   : > { %s663_s8 = sshll.u32 %s196_s10, 3  ;;  %s1760_s0 = sld [smem:[#allocation28_spill]] }
  0x40   : > { %1759 = sst [smem:[#allocation25_spill]] %s1758_s6  ;;  %s200_s13 = scalar_lea.vmem [#allocation3], %s663_s8 }
  0x41   : > { %s207_s2 = sshll.u32 %s200_s13, 4  ;;  %p1400_p0 = pnand %p1726_p13, %p54_p8  ;;  %s1404_s2 = int_to_ptr.vmem [resolvable:$true] %s207_s2 }
  0x42   : > { %s197_s6 = scalar_lea.sflag [#allocation4], %s196_s10 }
  0x43   : > { %p971_p4 = pneg %p1400_p0 }
  0x45   : > { %s1396_s12 = scalar_lea.hbm %s1760_s0, %s664_s11  ;;  %s974_s13 = scalar_lea.hbm %s1760_s0, 256 }
  0x46   : > { %s969_s4 = scalar_lea.hbm %s1396_s12, 128  ;;  %p975_p7 = scmp.lt.u32.totalorder %s1396_s12, %s1760_s0 }
  0x47   : > { %p970_p2 = scmp.ne.s32.totalorder %s1396_s12, %s969_s4  ;;  %p976_p8 = scmp.lt.u32.totalorder %s974_s13, %s969_s4 }
  0x48   : > { %p978_p10 = scmp.lt.u32.totalorder %s969_s4, %s1396_s12 }
  0x49   : > { %p972_p1 = pnand %p971_p4, %p970_p2  ;;  %p977_p9 = por %p976_p8, %p975_p7 }
  0x4b   : > { %p973_p6 = pneg %p972_p1  ;;  %p979_p13 = por %p978_p10, %p977_p9 }
  0x4d   : > { %p980_p3 = pnand %p979_p13, %p973_p6 }
  0x4f   : > { %983 = shalt.err (!%p980_p3)
}
  0x50   : > { %s984_s10 = scalar_lea.vmem %s1404_s2, 128  ;;  %s1222_s8 = smov [#allocation3]  }
  0x51   : > { %p985_p2 = scmp.ne.s32.totalorder %s1404_s2, %s984_s10  ;;  %s989_s9 = sshll.u32 %s1222_s8, 4  ;;  %s990_s9 = int_to_ptr.vmem [resolvable:$false] %s989_s9 }
  0x52   : > { %s991_s14 = scalar_lea.vmem %s990_s9, 256  ;;  %p992_p12 = scmp.lt.s32.totalorder %s1404_s2, %s990_s9 }
  0x53   : > { %p987_p1 = pnand %p985_p2, %p971_p4  ;;  %p993_p7 = scmp.lt.s32.totalorder %s991_s14, %s984_s10 }
  0x55   : > { %p988_p5 = pneg %p987_p1  ;;  %p994_p8 = por %p993_p7, %p992_p12 }
  0x57   : > { %p995_p9 = pnand %p994_p8, %p988_p5 }
  0x59   : > { %998 = shalt.err (!%p995_p9)
}
  0x5a   : > { %802 = dma.hbm_to_vmem [thread:$0]  (!%p1400_p0), %s1396_s12, 128, %s1404_s2, %s197_s6  }
  0x5b   : > { %s35_s4 = sadd.s32 1, %s1209_s26  ;;  %s73_s21 = sadd.s32 1, %s1185_s20 }
  0x5c   : > { %p36_p3 = scmp.ge.s32.totalorder %s35_s4, 2  ;;  %p80_p12 = scmp.ne.s32.totalorder %s1185_s20, %s1181_s19 }
  0x5d   : > { %p86_p5 = scmp.ne.s32.totalorder %s1181_s19, %s1177_s18  ;;  %s214_s13 = sand.u32 1, %s1217_s28  }
  0x5e   : > { %s1817_s4 = smov (%p36_p3, %s35_s4), 0  ;;  %s1763_s11 = sadd.s32 1, %s1213_s27 }
  0x5f   : > { %1762 = sst [smem:[#allocation26_spill]] %s1817_s4  ;;  %s1819_s11 = smov (!%p36_p3, %s1763_s11), %s1213_s27 }
  0x60   : > { %s1445_s10 = ssub.s32 %s1209_s26, %s1817_s4  ;;  %p1764_p13 = scmp.eq.s32.totalorder %s1217_s28, 0 }
  0x61   : > { %p40_p4 = scmp.ge.s32.totalorder %s1819_s11, 2  ;;  %p1766_p6 = scmp.eq.s32.totalorder %s1329_s29, 0 }
  0x62   : > { %p1449_p0 = por %p80_p12, %p1764_p13  ;;  %s216_s6 = sand.u32 1, %s1185_s20  }
  0x63   : > { %p1455_p10 = por %p86_p5, %p1766_p6  ;;  %s1821_s11 = smov (%p40_p4, %s1819_s11), 0 }
  0x64   : > { %s666_s12 = sshll.u32 %s1213_s27, 1  ;;  %s42_s8 = ssub.s32 %s1213_s27, %s1821_s11 }
  0x65   : > { %s1767_s18 = scalar_select %p1455_p10, 1, 0 }
  0x66   : > { %s665_s9 = sshll.u32 %s216_s6, 3  ;;  %p43_p1 = scmp.eq.s32.totalorder %s42_s8, 0 }
  0x67   : > { %1768 = sst [smem:[#allocation27_spill]] %s1767_s18  ;;  %s70_s14 = sor.u32 %s1445_s10, %s42_s8 }
  0x68   : > { %p71_p7 = scmp.eq.s32.totalorder %s70_s14, 0  ;;  %s1769_s0 = sadd.s32 1, %s1197_s23 }
  0x69   : > { %s1470_s4 = scalar_select %p43_p1, %s1197_s23, %s1769_s0  }
  0x6a   : > { %s1473_s5 = scalar_select %p71_p7, %s1185_s20, %s73_s21  }
  0x6b   : > { %s223_s25 = sadd.s32 %s1209_s26, %s666_s12  ;;  %s218_s24 = scalar_lea.vmem [#allocation6], %s665_s9 }
  0x6c   : > { %s227_s18 = sshll.u32 %s218_s24, 4  ;;  %s667_s19 = sshll.u32 %s223_s25, 7  ;;  %s1476_s18 = int_to_ptr.vmem [resolvable:$true] %s227_s18 }
  0x6d   : > { %s1481_s30 = scalar_lea.hbm %s1715_s1, %s667_s19  ;;  %p1770_p8 = scmp.lt.s32.totalorder %s1217_s28, 4 }
  0x6e   : > { %s215_s24 = scalar_lea.sflag [#allocation7], %s214_s13  ;;  %s999_s25 = scalar_lea.hbm %s1481_s30, 128 }
  0x6f   : > { %p1487_p9 = pnand %p1770_p8, %p1449_p0  ;;  %p1000_p3 = scmp.ne.s32.totalorder %s1481_s30, %s999_s25 }
  0x70   : > { %s1004_s7 = scalar_lea.hbm %s1715_s1, 512  ;;  %p1005_p0 = scmp.lt.u32.totalorder %s1481_s30, %s1715_s1 }
  0x71   : > { %p1001_p12 = pneg %p1487_p9  ;;  %p1006_p4 = scmp.lt.u32.totalorder %s1004_s7, %s999_s25 }
  0x72   : > { %p1008_p1 = scmp.lt.u32.totalorder %s999_s25, %s1481_s30 }
  0x73   : > { %p1002_p5 = pnand %p1001_p12, %p1000_p3  ;;  %p1007_p6 = por %p1006_p4, %p1005_p0 }
  0x75   : > { %p1003_p13 = pneg %p1002_p5  ;;  %p1009_p7 = por %p1008_p1, %p1007_p6 }
  0x77   : > { %p1010_p8 = pnand %p1009_p7, %p1003_p13 }
  0x79   : > { %1013 = shalt.err (!%p1010_p8)
}
  0x7a   : > { %s1014_s13 = scalar_lea.vmem %s1476_s18, 128  ;;  %s1223_s6 = smov [#allocation6]  }
  0x7b   : > { %p1015_p3 = scmp.ne.s32.totalorder %s1476_s18, %s1014_s13  ;;  %s1019_s12 = sshll.u32 %s1223_s6, 4  ;;  %s1020_s12 = int_to_ptr.vmem [resolvable:$false] %s1019_s12 }
  0x7c   : > { %s1021_s8 = scalar_lea.vmem %s1020_s12, 256  ;;  %p1022_p10 = scmp.lt.s32.totalorder %s1476_s18, %s1020_s12 }
  0x7d   : > { %p1017_p5 = pnand %p1015_p3, %p1001_p12  ;;  %p1023_p0 = scmp.lt.s32.totalorder %s1021_s8, %s1014_s13 }
  0x7f   : > { %p1018_p2 = pneg %p1017_p5  ;;  %p1024_p4 = por %p1023_p0, %p1022_p10 }
  0x81   : > { %p1025_p6 = pnand %p1024_p4, %p1018_p2 }
  0x83   : > { %1028 = shalt.err (!%p1025_p6)
}
  0x84   : > { %805 = dma.hbm_to_vmem [thread:$0]  (!%p1487_p9), %s1481_s30, 128, %s1476_s18, %s215_s24  }
  0x85   : > { %s120_s9 = sadd.s32 1, %s1173_s17  ;;  %p1772_p10 = scmp.eq.s32.totalorder %s1445_s10, 0 }
  0x86   : > { %p127_p2 = scmp.ne.s32.totalorder %s1173_s17, %s1169_s16  ;;  %p133_p12 = scmp.ne.s32.totalorder %s1169_s16, %s1165_s15 }
  0x87   : > { %s1520_s14 = scalar_select %p1772_p10, %s1173_s17, %s120_s9  }
  0x88   : > { %s234_s0 = sand.u32 1, %s1173_s17   ;;  %s684_s25 = sshll.u32 %s1209_s26, 11 }
  0x89   : > { %p1773_p13 = scmp.eq.s32.totalorder %s1217_s28, 0  ;;  %p1774_p7 = scmp.eq.s32.totalorder %s1329_s29, 0 }
  0x8a   : > { %s668_s22 = sshll.u32 %s234_s0, 7  ;;  %s1539_s30 = scalar_lea.hbm %s1717_s3, %s684_s25 }
  0x8b   : > { %p129_p1 = por %p127_p2, %p1773_p13  ;;  %p1532_p8 = por %p133_p12, %p1774_p7 }
  0x8c   : > { %s238_s15 = scalar_lea.vmem [#allocation9], %s668_s22  ;;  %p1776_p9 = scmp.lt.s32.totalorder %s1217_s28, 4 }
  0x8d   : > { %s1775_s19 = scalar_select %p1532_p8, 1, 0 }
  0x8e   : > { %s245_s10 = sshll.u32 %s238_s15, 4  ;;  %p1543_p3 = pnand %p1776_p9, %p129_p1  ;;  %s1547_s10 = int_to_ptr.vmem [resolvable:$true] %s245_s10 }
  0x8f   : > { %s1549_s24 = scalar_lea.sflag [#allocation10], %s234_s0  ;;  %s1029_s2 = scalar_lea.hbm %s1539_s30, 2048 }
  0x90   : > { %p1030_p5 = scmp.ne.s32.totalorder %s1539_s30, %s1029_s2  ;;  %p1031_p0 = pneg %p1543_p3 }
  0x91   : > { %s1034_s12 = scalar_lea.hbm %s1717_s3, 4096  ;;  %p1035_p10 = scmp.lt.u32.totalorder %s1539_s30, %s1717_s3 }
  0x92   : > { %p1032_p4 = pnand %p1031_p0, %p1030_p5  ;;  %p1036_p2 = scmp.lt.u32.totalorder %s1034_s12, %s1029_s2 }
  0x93   : > { %p1038_p13 = scmp.lt.u32.totalorder %s1029_s2, %s1539_s30 }
  0x94   : > { %p1033_p6 = pneg %p1032_p4  ;;  %p1037_p12 = por %p1036_p2, %p1035_p10 }
  0x96   : > { %p1039_p1 = por %p1038_p13, %p1037_p12 }
  0x98   : > { %p1040_p7 = pnand %p1039_p1, %p1033_p6 }
  0x9a   : > { %1043 = shalt.err (!%p1040_p7)
}
  0x9b   : > { %s1044_s0 = scalar_lea.vmem %s1547_s10, 2048  ;;  %s1224_s25 = smov [#allocation9]  }
  0x9c   : > { %p1045_p9 = scmp.ne.s32.totalorder %s1547_s10, %s1044_s0  ;;  %s1049_s22 = sshll.u32 %s1224_s25, 4  ;;  %s1050_s22 = int_to_ptr.vmem [resolvable:$false] %s1049_s22 }
  0x9d   : > { %s1051_s7 = scalar_lea.vmem %s1050_s22, 4096  ;;  %p1052_p8 = scmp.lt.s32.totalorder %s1547_s10, %s1050_s22 }
  0x9e   : > { %p1047_p5 = pnand %p1045_p9, %p1031_p0  ;;  %p1053_p10 = scmp.lt.s32.totalorder %s1051_s7, %s1044_s0 }
  0xa0   : > { %p1048_p4 = pneg %p1047_p5  ;;  %p1054_p2 = por %p1053_p10, %p1052_p8 }
  0xa2   : > { %p1055_p12 = pnand %p1054_p2, %p1048_p4 }
  0xa4   : > { %1058 = shalt.err (!%p1055_p12)
}
  0xa5   : > { %s1778_s21 = smov 8   ;;  %s1779_s15 = smov 128  }
  0xa6   : > { %808 = dma.hbm_to_vmem [thread:$0]  (!%p1543_p3), %s1539_s30, 2048, %s1547_s10, %s1549_s24, %s1779_s15, %s1779_s15, %s1778_s21  }
  0xa7   : > { %s1780_s2 = sld [smem:[#allocation22_spill]] }
  0xad   : > { %p1781_p0 = scmp.ne.s32.totalorder %s1780_s2, 0 }
  0xae   : > { %s1782_s13 = sld [smem:[#allocation19_spill]] (!%p1781_p0) }
  0xaf   : > { %257 = sbr.rel (%p1781_p0) target bundleno = 719 (0x2cf), region = 36 }
  0xb4   : > { %s1583_s12 = sand.u32 (!%p1781_p0), 1, %s1782_s13  }
  0xb5   : > { %s672_s8 = sshll.u32 (!%p1781_p0), %s1583_s12, 3  ;;  %s260_s9 = scalar_lea.sflag (!%p1781_p0), [#allocation4], %s1583_s12 }
  0xb6   : > { %s1587_s0 = scalar_lea.vmem [#allocation3], %s672_s8 }
  0xb7   : > { %1144 = dma.done.wait (%p1378_p11), %s260_s9, 128  }
  0xb8   : > { %1146 = vsyncadd (%p1378_p11), %s260_s9, 4294967168  ;;  %s1784_s30 = sld [smem:[#allocation17_spill]]  ;;  %s1785_s10 = sld [smem:[#allocation27_spill]] }
  0xb9   : > { %s268_s18 = sand.u32 1, %s1329_s29  }
  0xba   : > { %s269_s22 = scalar_lea.sflag [#allocation7], %s268_s18 }
  0xbe   : > { %s270_s24 = sand.u32 1, %s1784_s30   ;;  %p1786_p8 = scmp.ne.s32.totalorder %s1785_s10, 0 }
  0xbf   : > { %s1595_s25 = sshll.u32 %s270_s24, 3 }
  0xc0   : > { %s272_s7 = scalar_lea.vmem [#allocation6], %s1595_s25 }
  0xc1   : > { %1148 = dma.done.wait (%p1786_p8), %s269_s22, 128  }
  0xc2   : > { %1150 = vsyncadd (%p1786_p8), %s269_s22, 4294967168  ;;  %p1787_p3 = scmp.eq.s32.totalorder %s1329_s29, 0 }
  0xc4   : > { %1152 = dma.done.wait (%p1787_p3), [#allocation7], 512   ;;  %p1788_p11 = pmov %p1787_p3 }
  0xc5   : > { %s281_s21 = sand.u32 1, %s1169_s16   ;;  %p1789_p6 = scmp.ne.s32.totalorder %s1775_s19, 0 }
  0xc6   : > { %1154 = vsyncadd (%p1788_p11), [#allocation7], 4294966784  ;;  %s675_s15 = sshll.u32 %s281_s21, 7  ;;  %s282_s2 = scalar_lea.sflag [#allocation10], %s281_s21 }
  0xc7   : > { %s1607_s13 = scalar_lea.vmem [#allocation9], %s675_s15 }
  0xc8   : > { %1156 = dma.done.wait (%p1789_p6), %s282_s2, 2048  }
  0xc9   : > { %1158 = vsyncadd (%p1789_p6), %s282_s2, 4294965248  ;;  %s1613_s6 = scalar_lea.vmem [#allocation11], %s672_s8  ;;  %s1790_s9 = sld [smem:[#allocation20_spill]] }
  0xcf   : > { %p677_p13 = scmp.ne.s32.totalorder %s1790_s9, 0 }
  0xd0   : > { %v1225_v0 = vmov (!%p677_p13), 0.0  }
  0xd1   : > { %324 = sbr.rel (%p677_p13) target bundleno = 216 (0xd8), region = 56  ;;  %325 = vst [vmem:[#allocation2] sm:$0xff] (!%p677_p13), %v1225_v0 }
  0xd8 PF: > { %v328_v1 = vld [vmem:[%s1607_s13] sm:$0xff]  ;;  %v329_v2 = vld [vmem:[%s1607_s13 + $0x8] sm:$0xff]  ;;  %v330_v3 = vld [vmem:[%s1607_s13 + $0x10] sm:$0xff]  ;;  %v1226_v4 = vmov 0.0|0.0   ;;  %vm1227_vm0 = vmmov 0   ;;  %v1228_v7 = vmov 0.0  }
  0xd9   : > { %753 = vmatprep.subr.bf16.mxu0 %v1226_v4  ;;  %v754_v5 = vpack.c.bf16 %v329_v2, %v328_v1  ;;  %v331_v6 = vld [vmem:[%s1607_s13 + $0x18] sm:$0xff]  ;;  %739 = vmatprep.mubr.msk.f32.mxu0 %vm1227_vm0, %v1228_v7  ;;  %v332_v9 = vld [vmem:[%s1607_s13 + $0x20] sm:$0xff]  ;;  %v333_v10 = vld [vmem:[%s1607_s13 + $0x28] sm:$0xff]  ;;  %s1791_s29 = sld [smem:[#allocation20_spill]] }
  0xda   : > { %v757_v8 = vpack.c.bf16 %v331_v6, %v330_v3  ;;  %v760_v11 = vpack.c.bf16 %v333_v10, %v332_v9  ;;  %v334_v12 = vld [vmem:[%s1607_s13 + $0x30] sm:$0xff]  ;;  %v335_v13 = vld [vmem:[%s1607_s13 + $0x38] sm:$0xff]  ;;  %v336_v15 = vld [vmem:[%s1607_s13 + $0x40] sm:$0xff] }
  0xdb   : > { %755 = vmatpush3.bf16.msra.mxu0 %v754_v5  ;;  %v763_v14 = vpack.c.bf16 %v335_v13, %v334_v12  ;;  %v337_v16 = vld [vmem:[%s1607_s13 + $0x48] sm:$0xff]  ;;  %v338_v18 = vld [vmem:[%s1607_s13 + $0x50] sm:$0xff]  ;;  %v339_v19 = vld [vmem:[%s1607_s13 + $0x58] sm:$0xff] }
  0xdc   : > { %756 = vmatprep.subr.bf16.mxu0 %v1226_v4  ;;  %v766_v17 = vpack.c.bf16 %v337_v16, %v336_v15  ;;  %v769_v20 = vpack.c.bf16 %v339_v19, %v338_v18  ;;  %v340_v21 = vld [vmem:[%s1607_s13 + $0x60] sm:$0xff]  ;;  %v341_v22 = vld [vmem:[%s1607_s13 + $0x68] sm:$0xff]  ;;  %v342_v24 = vld [vmem:[%s1607_s13 + $0x70] sm:$0xff] }
  0xdd   : > { %v772_v23 = vpack.c.bf16 %v341_v22, %v340_v21  ;;  %v343_v25 = vld [vmem:[%s1607_s13 + $0x78] sm:$0xff] }
  0xde   : > { %v775_v26 = vpack.c.bf16 %v343_v25, %v342_v24  ;;  %v327_v27 = vld [vmem:[%s272_s7] sm:$0xff] }
  0xdf   : > { %758 = vmatpush3.bf16.msra.mxu0 %v757_v8  ;;  %v326_v28 = vld [vmem:[#allocation2] sm:$0xff]  ;;  %p678_p1 = scmp.ne.s32.totalorder %s1791_s29, 1 }
  0xe0   : > { %759 = vmatprep.subr.bf16.mxu0 %v1226_v4  ;;  %v421_v32 = vld [vmem:[#allocation8] sm:$0xff] (!%p678_p1)  ;;  %v422_v33 = vld [vmem:[#allocation8 + $0x8] sm:$0xff] (!%p678_p1)  ;;  %v423_v34 = vld [vmem:[#allocation8 + $0x10] sm:$0xff] (!%p678_p1)  ;;  %v1229_v35 = vmov (!%p678_p1), 0.0|0.0   ;;  %vm1230_vm1 = vmmov (!%p678_p1), 0   ;;  %v1231_v38 = vmov (!%p678_p1), 0.0  }
  0xe1   : > { %v778_v36 = vpack.c.bf16 (!%p678_p1), %v422_v33, %v421_v32  ;;  %v424_v37 = vld [vmem:[#allocation8 + $0x18] sm:$0xff] (!%p678_p1)  ;;  %v420_v40 = vld [vmem:[%s1587_s0] sm:$0xff] (!%p678_p1)  ;;  %vm425_vm2 = vcmask (!%p678_p1), 261120  }
  0xe2   : > { %v781_v39 = vpack.c.bf16 (!%p678_p1), %v424_v37, %v423_v34 }
  0xe3   : > { %761 = vmatpush3.bf16.msra.mxu0 %v760_v11 }
  0xe4   : > { %762 = vmatprep.subr.bf16.mxu0 %v1226_v4 }
  0xe7   : > { %764 = vmatpush3.bf16.msra.mxu0 %v763_v14 }
  0xe8   : > { %765 = vmatprep.subr.bf16.mxu0 %v1226_v4 }
  0xeb   : > { %767 = vmatpush3.bf16.msra.mxu0 %v766_v17 }
  0xec   : > { %768 = vmatprep.subr.bf16.mxu0 %v1226_v4 }
  0xef   : > { %770 = vmatpush3.bf16.msra.mxu0 %v769_v20 }
  0xf0   : > { %771 = vmatprep.subr.bf16.mxu0 %v1226_v4 }
  0xf3   : > { %773 = vmatpush3.bf16.msra.mxu0 %v772_v23 }
  0xf4   : > { %774 = vmatprep.subr.bf16.mxu0 %v1226_v4 }
  0xf7   : > { %776 = vmatpush3.bf16.msra.mxu0 %v775_v26 }
  0xf8   : > { %777 = vmatprep.subr.bf16.mxu0 (!%p678_p1), %v1229_v35 }
  0xfa   : > { %740 = vmatmul.mubr.f32.vlgmr.msra.gmra.mrb[0].mxu0 %v327_v27 }
  0xfb   : > { %750 = vmatprep.mubr.msk.f32.mxu0 (!%p678_p1), %vm1230_vm1, %v1231_v38  ;;  %779 = vmatpush3.bf16.msra.mxu0 (!%p678_p1), %v778_v36 }
  0xfc   : > { %780 = vmatprep.subr.bf16.mxu0 (!%p678_p1), %v1229_v35 }
  0xff   : > { %782 = vmatpush3.bf16.msra.mxu0 (!%p678_p1), %v781_v39 }
 0x1ca   : > { %419 = sbr.rel (%p678_p1) target bundleno = 692 (0x2b4), region = 60 }
 0x1cd   : > { %v410_v29 = vpop.f32.mrb[0].mxu0 }
 0x1ce   : > { %v414_v30 = vadd.f32 %v410_v29, %v326_v28  ;;  %v741_v31 = vpop.f32.mrb[1].mxu0  ;;  %751 = vmatmul.mubr.msk.f32.vlgmr.msra.gmra.mrb[0].mxu0 (!%p678_p1), %vm425_vm2, %v420_v40 }
 0x1d0   : > { %415 = vst [vmem:[#allocation2] sm:$0xff] %v414_v30 }
 0x1d7   : > { %v501_v44 = vld [vmem:[#allocation2] sm:$0xff] }
 0x2a1   : > { %v495_v41 = vpop.f32.mrb[0].mxu0 }
 0x2a2   : > { %vm499_vm3 = vcmp.eq.f32.partialorder %v495_v41, 0.0  ;;  %v752_v42 = vpop.f32.mrb[1].mxu0 }
 0x2a3   : > { %v500_v43 = vsel %vm499_vm3, 1.1920929e-07, %v495_v41 }
 0x2a4   : > { %939 = vrcp.f32 %v500_v43 }
 0x2ae   : > { %v940_v45 = vpop.eup %939 }
 0x2af   : > { %v503_v46 = vmul.f32 %v940_v45, %v501_v44 }
 0x2b1   : > { %v504_v47 = vmul.f32 %v503_v46, %v420_v40 }
 0x2b3   : > { %505 = vst.msk [vmem:[%s1613_s6] sm:$0xff] %vm425_vm2, %v504_v47 }
 0x2b4 PF: > { %s1792_s19 = sld [smem:[#allocation21_spill]]  ;;  %s1793_s8 = sld [smem:[#allocation24_spill]] }
 0x2b5   : > { %s1794_s18 = sld [smem:[#allocation30_spill]]  ;;  %s520_s25 = sshll.u32 %s1613_s6, 4  ;;  %s521_s25 = int_to_ptr.vmem [resolvable:$true] %s520_s25 }
 0x2b6   : > { %s507_s22 = scalar_lea.sflag [#allocation5], %s1583_s12  ;;  %s1059_s21 = scalar_lea.vmem %s521_s25, 128 }
 0x2b7   : > { %p1060_p7 = scmp.ne.s32.totalorder %s521_s25, %s1059_s21  ;;  %s1232_s15 = smov [#allocation11]  }
 0x2b8   : > { %s1063_s2 = sshll.u32 %s1232_s15, 4  ;;  %s1064_s2 = int_to_ptr.vmem [resolvable:$false] %s1063_s2 }
 0x2b9   : > { %s1065_s13 = scalar_lea.vmem %s1064_s2, 256  ;;  %p1066_p10 = scmp.lt.s32.totalorder %s521_s25, %s1064_s2 }
 0x2ba   : > { %s681_s30 = sshll.u32 %s1792_s19, 7  ;;  %p1796_p9 = scmp.ne.s32.totalorder %s1793_s8, 0 }
 0x2bb   : > { %s1795_s7 = smov %s1794_s18  ;;  %s1641_s24 = scalar_lea.hbm %s1794_s18, %s681_s30 }
 0x2bc   : > { %p1061_p5 = pnand %p1060_p7, %p1796_p9  ;;  %p1067_p2 = scmp.lt.s32.totalorder %s1065_s13, %s1059_s21 }
 0x2be   : > { %p1062_p4 = pneg %p1061_p5  ;;  %p1068_p12 = por %p1067_p2, %p1066_p10 }
 0x2c0   : > { %p1069_p0 = pnand %p1068_p12, %p1062_p4 }
 0x2c2   : > { %1072 = shalt.err (!%p1069_p0)
}
 0x2c3   : > { %s1073_s12 = scalar_lea.hbm %s1641_s24, 128  ;;  %s1077_s29 = scalar_lea.hbm %s1795_s7, 256 }
 0x2c4   : > { %p1074_p8 = scmp.ne.s32.totalorder %s1641_s24, %s1073_s12  ;;  %p1078_p6 = scmp.lt.u32.totalorder %s1641_s24, %s1795_s7 }
 0x2c5   : > { %p1079_p13 = scmp.lt.u32.totalorder %s1077_s29, %s1073_s12  ;;  %p1081_p7 = scmp.lt.u32.totalorder %s1073_s12, %s1641_s24 }
 0x2c6   : > { %p1075_p3 = pnand %p1074_p8, %p1796_p9 }
 0x2c7   : > { %p1080_p1 = por %p1079_p13, %p1078_p6 }
 0x2c8   : > { %p1076_p11 = pneg %p1075_p3 }
 0x2c9   : > { %p1082_p5 = por %p1081_p7, %p1080_p1 }
 0x2cb   : > { %p1083_p4 = pnand %p1082_p5, %p1076_p11 }
 0x2cd   : > { %1086 = shalt.err (!%p1083_p4)
}
 0x2ce   : > { %793 = dma.vmem_to_hbm [thread:$0]  (%p1796_p9), %s521_s25, 128, %s1641_s24, %s507_s22  }
 0x2cf PF: > { %s1797_s10 = sld [smem:[#allocation18_spill]]  ;;  %s1798_s0 = sld [smem:[#allocation25_spill]] }
 0x2d0   : > { %p816_p10 = scmp.ge.s32.totalorder %s1217_s28, 2 }
 0x2d5   : > { %s532_s18 = sand.u32 1, %s1797_s10   ;;  %p1799_p2 = scmp.ne.s32.totalorder %s1798_s0, 0 }
 0x2d6   : > { %s533_s21 = scalar_lea.sflag [#allocation5], %s532_s18 }
 0x2d7   : > { %p810_p12 = pnand %p816_p10, %p1799_p2 }
 0x2d9   : > { %1160 = dma.done.wait (!%p810_p12), %s533_s21, 128  }
 0x2da   : > { %1162 = vsyncadd (!%p810_p12), %s533_s21, 4294967168  ;;  %s26_s28 = sadd.s32 1, %s1217_s28   ;;  %s1801_s18 = sld [smem:[#allocation17_spill]] }
 0x2db   : > { %p1667_p0 = scmp.ge.s32.totalorder %s26_s28, 6   ;;  %s1802_s21 = sld [smem:[#allocation19_spill]] }
 0x2dc   : > { %s1803_s8 = sld [smem:[#allocation26_spill]]  ;;  %s1805_s15 = smov %s1169_s16 }
 0x2dd   : > { %s1806_s16 = smov %s1173_s17  ;;  %s1807_s17 = smov %s1520_s14 }
 0x2de   : > { %s1808_s19 = smov %s1185_s20  ;;  %s1809_s20 = smov %s1473_s5 }
 0x2df   : > { %s1810_s22 = smov %s1197_s23  ;;  %s1811_s23 = smov %s1470_s4 }
 0x2e0   : > { %s1812_s24 = smov %s1209_s26  ;;  %s1813_s25 = smov %s1213_s27 }
 0x2e1   : > { %s1815_s27 = smov %s1821_s11  ;;  %25 = sbr.rel (!%p1667_p0) target bundleno = 18 (0x12), region = 119 }
 0x2e2   : > { %s1814_s26 = smov %s1803_s8 }
 0x2e8   :  { %538 = vsyncpa [#allocation4], 1 }
 0x2e9   :  { %540 = vsyncpa [#allocation4 + $0x1], 1 }
 0x2ea   :  { %541 = vsyncpa [#allocation7], 1 }
 0x2eb   :  { %543 = vsyncpa [#allocation7 + $0x1], 1 }
 0x2ec   :  { %544 = vsyncpa [#allocation10], 1 }
 0x2ed   :  { %546 = vsyncpa [#allocation10 + $0x1], 1 }
 0x2ee   :  { %547 = vsyncpa [#allocation5], 1 }
 0x2ef   :  { %549 = vsyncpa [#allocation5 + $0x1], 1 }

</bundles_post_ra>
